<compile_context>
chip_gen: v7x
topology: tpu7x:2x2x1
jax: 0.10.0
libtpu: 0.0.40
codegen_flags: <defaults>
</compile_context>

<pallas_src>
import math

import jax
import jax.numpy as jnp
from jax.experimental import pallas as pl
from jax.experimental.pallas import tpu as pltpu

_LANE = 128
_MIB = 1024 * 1024


def _sin_kernel(freq_ref, x_ref, o_ref):
    # Elementwise hot path: broadcast freq (1, W) over x tile (tr, W).
    # Multiply on the VPU, sin on the EUP.
    f = freq_ref[...].astype(jnp.float32)
    x = x_ref[...].astype(jnp.float32)
    o_ref[...] = jnp.sin(f * x).astype(o_ref.dtype)


def _sublane(dtype) -> int:
    # 8 for 32-bit, 16 for 16-bit, 32 for 8-bit dtypes.
    return max(8, 32 // jnp.dtype(dtype).itemsize)


def _chip_info():
    """Return (vmem_capacity_bytes, num_tensorcores) with safe fallbacks."""
    vmem = 64 * _MIB  # conservative default (v7x-class)
    try:
        info = pltpu.get_tpu_info()
        vmem = int(getattr(info, "vmem_capacity_bytes", vmem))
    except Exception:
        pass
    # v7x-class chips have 64 MiB VMEM per TC and 2 TCs; v5e/v6e have 128 MiB
    # and a single TC, so the VMEM size is a reliable generation proxy.
    num_tc = 2 if vmem <= 64 * _MIB else 1
    return vmem, num_tc


def _pick_tile_rows(n_rows, row_bytes, sub, vmem_bytes, num_tc):
    """Row-tile size: generation-aware multi-MiB tiles, sublane-aligned, with
    a 2-way split only on 2-TC chips when the array would otherwise fit one
    block (so ("parallel",) sharding actually uses both TensorCores)."""
    if n_rows <= sub:
        return n_rows  # single full block; block dim == array dim is legal
    if vmem_bytes <= 64 * _MIB:      # v7x-class: 64 MiB VMEM / TC
        target_bytes = 4 * _MIB
    else:                            # v5e / v6e: 128 MiB VMEM, 1 TC
        target_bytes = 12 * _MIB
    tr = max(sub, (target_bytes // max(1, row_bytes)) // sub * sub)
    if tr >= n_rows:
        # Whole array fits one tile.
        if num_tc >= 2 and n_rows >= 2 * sub:
            # Split ~evenly so both TensorCores get work (v7x megacore).
            half = (n_rows + 1) // 2
            tr = max(sub, pl.cdiv(half, sub) * sub)
        else:
            # Single-TC chip: extra grid steps are pure overhead.
            tr = n_rows
    return tr


def sin_module(x, freq, *, tile_rows=None):
    """Apply sin(freq * x).

    x:    (..., dim) array (any number of leading dims).
    freq: (1, dim) parameter.
    """
    orig_shape = x.shape
    D = orig_shape[-1]
    assert freq.shape == (1, D), f"freq must have shape (1, {D})"

    # Flatten leading batch/seq dims into a single row axis (free reshape).
    L = int(math.prod(orig_shape[:-1])) if len(orig_shape) > 1 else 1
    x2 = x.reshape(L, D)

    # Lane-dense repack: fold k = 128/gcd(D,128) consecutive rows into the
    # lane axis so the last dim becomes a multiple of 128. Pure row-major
    # relayout; freq tiled k times gives identical math.
    k = _LANE // math.gcd(D, _LANE)
    if k > 1 and L % k == 0:
        x_w = x2.reshape(L // k, k * D)
        freq_w = jnp.tile(freq, (1, k))
    else:
        x_w = x2
        freq_w = freq

    R, W = x_w.shape
    itemsize = jnp.dtype(x_w.dtype).itemsize
    sub = _sublane(x_w.dtype)
    vmem_bytes, num_tc = _chip_info()

    if tile_rows is None:
        tile_rows = _pick_tile_rows(R, W * itemsize, sub, vmem_bytes, num_tc)
    else:
        tile_rows = min(int(tile_rows), R)
        if tile_rows < R:
            # Blocks smaller than the array must be sublane-aligned.
            tile_rows = max(sub, (tile_rows // sub) * sub)

    # No padding / slicing around the kernel: a non-divisible last block is
    # handled by Pallas (bounded reads, masked out-of-range writes), which is
    # safe for this elementwise op.
    n_blocks = pl.cdiv(R, tile_rows)
    grid = (n_blocks,)

    # VMEM budget: double-buffered input + output tiles + freq + headroom,
    # capped per generation (conservative on v7x's 64 MiB VMEM, roomier on
    # v5e/v6e's 128 MiB so the larger tiles are actually legal).
    tile_bytes = tile_rows * W * itemsize
    vmem_cap = 40 * _MIB if vmem_bytes <= 64 * _MIB else 64 * _MIB
    vmem_limit = int(min(vmem_cap, max(8 * _MIB, 6 * tile_bytes)))

    out = pl.pallas_call(
        _sin_kernel,
        out_shape=jax.ShapeDtypeStruct((R, W), x_w.dtype),
        grid_spec=pltpu.PrefetchScalarGridSpec(
            num_scalar_prefetch=0,
            grid=grid,
            in_specs=[
                # freq is tiny and reused by every tile: same block each step.
                pl.BlockSpec((1, W), lambda i: (0, 0)),
                pl.BlockSpec((tile_rows, W), lambda i: (i, 0)),
            ],
            out_specs=pl.BlockSpec((tile_rows, W), lambda i: (i, 0)),
        ),
        compiler_params=pltpu.CompilerParams(
            dimension_semantics=("parallel",),
            vmem_limit_bytes=vmem_limit,
        ),
        cost_estimate=pl.CostEstimate(
            flops=R * W,
            transcendentals=R * W,
            bytes_accessed=2 * R * W * itemsize,
        ),
    )(freq_w, x_w)

    return out.reshape(orig_shape)


if __name__ == "__main__":
    # Module config (matches Sin(dim, w=10, train_freq=True))
    dim = 32
    w = 10.0

    # Deterministic parameter init: freq = w * ones(1, dim), as in __init__.
    freq = w * jnp.ones((1, dim), dtype=jnp.float32)

    key = jax.random.PRNGKey(0)
    k1, k2, k3 = jax.random.split(key, 3)

    # Small batched input (batch=2, seq=8, hidden=32): exercises flattening +
    # lane-dense repack (k=4 -> (4, 128)), single full block.
    x_small = jax.random.normal(k1, (2, 8, dim), dtype=jnp.float32)
    out_small = jax.block_until_ready(sin_module(x_small, freq))
    ref_small = jnp.sin(freq * x_small)
    assert out_small.shape == x_small.shape
    assert jnp.allclose(out_small, ref_small, atol=1e-5, rtol=1e-5)

    # Larger input with a forced non-divisible grid: 1000 rows repack to
    # (250, 128); tile_rows=64 -> 4 blocks, last block partial (58 rows),
    # exercising the pad-free masked-write path.
    x_big = jax.random.normal(k2, (1000, dim), dtype=jnp.float32)
    out_big = jax.block_until_ready(sin_module(x_big, freq, tile_rows=64))
    ref_big = jnp.sin(freq * x_big)
    assert out_big.shape == x_big.shape
    assert jnp.allclose(out_big, ref_big, atol=1e-5, rtol=1e-5)

    # Dim coprime with 128 and rows not foldable: falls through to the plain
    # (L, D) layout where block width == full array width.
    dim_odd = 33
    freq_odd = w * jnp.ones((1, dim_odd), dtype=jnp.float32)
    x_odd = jax.random.normal(k3, (7, dim_odd), dtype=jnp.float32)
    out_odd = jax.block_until_ready(sin_module(x_odd, freq_odd))
    ref_odd = jnp.sin(freq_odd * x_odd)
    assert out_odd.shape == x_odd.shape
    assert jnp.allclose(out_odd, ref_odd, atol=1e-5, rtol=1e-5)

    print("KERNEL_OK")
</pallas_src>

<mosaic_0001>
module attributes {stable_mosaic.version = 11 : i64} {
  func.func @_sin_kernel(%arg0: i32, %arg1: memref<1x128xf32, #tpu.memory_space<vmem>>, %arg2: memref<4x128xf32, #tpu.memory_space<vmem>>, %arg3: memref<4x128xf32, #tpu.memory_space<vmem>>) attributes {dimension_semantics = [#tpu.dimension_semantics<parallel>], iteration_bounds = array<i64: 1>, scalar_prefetch = 0 : i64, scratch_operands = 0 : i64, tpu.core_type = #tpu.core_type<tc>, window_params = [{pipeline_mode = #tpu.pipeline_mode<synchronous>, transform_indices = @transform_0, window_bounds = array<i64: 1, 128>}, {transform_indices = @transform_1, window_bounds = array<i64: 4, 128>}, {transform_indices = @transform_2, window_bounds = array<i64: 4, 128>}]} {
    %c0 = arith.constant 0 : index
    %c0_0 = arith.constant 0 : index
    %0 = vector.load %arg1[%c0, %c0_0] : memref<1x128xf32, #tpu.memory_space<vmem>>, vector<1x128xf32>
    %c0_1 = arith.constant 0 : index
    %c0_2 = arith.constant 0 : index
    %1 = vector.load %arg2[%c0_1, %c0_2] : memref<4x128xf32, #tpu.memory_space<vmem>>, vector<4x128xf32>
    %2 = vector.broadcast %0 : vector<1x128xf32> to vector<4x128xf32>
    %3 = arith.mulf %2, %1 : vector<4x128xf32>
    %4 = math.sin %3 : vector<4x128xf32>
    %c0_3 = arith.constant 0 : index
    %c0_4 = arith.constant 0 : index
    %5 = vector.load %arg3[%c0_3, %c0_4] : memref<4x128xf32, #tpu.memory_space<vmem>>, vector<4x128xf32>
    tpu.vector_store %arg3[%c0_3, %c0_4], %4 {strides = array<i32>} : memref<4x128xf32, #tpu.memory_space<vmem>>, vector<4x128xf32>,
    return
  }
  func.func @transform_0(%arg0: i32) -> (i32, i32) {
    %c0_i32 = arith.constant 0 : i32
    %c0_i32_0 = arith.constant 0 : i32
    %c0_i32_1 = arith.constant 0 : i32
    return %c0_i32, %c0_i32_0 : i32, i32
  }
  func.func @transform_1(%arg0: i32) -> (i32, i32) {
    %c0_i32 = arith.constant 0 : i32
    %c0_i32_0 = arith.constant 0 : i32
    return %arg0, %c0_i32 : i32, i32
  }
  func.func @transform_2(%arg0: i32) -> (i32, i32) {
    %c0_i32 = arith.constant 0 : i32
    %c0_i32_0 = arith.constant 0 : i32
    return %arg0, %c0_i32 : i32, i32
  }
}

</mosaic_0001>

<bundles_post_ra>
// kernel: tpu_custom_call.1
= control target key start
LH: loop header
LB: loop body
LE: loop exit
PB: predicated region body
PF: predicated region fallthrough
CT: control target
= control target key end

     0   :  { %7 = vsyncpa [#allocation3], 0  ;;  %s341_s0 = inlined_call_operand.hbm [shape: f32[1,128], index: 0, kind: input, shape index: {}]   ;;  %s342_s1 = inlined_call_operand.hbm [shape: f32[4,128], index: 1, kind: input, shape index: {}]   ;;  %s343_s2 = inlined_call_operand.hbm [shape: f32[4,128], index: 2, kind: output, shape index: {}]  }
   0x1   :  { %8 = vsyncpa [#allocation6], 0 }
   0x2   :  { %9 = vsyncpa [#allocation4], 0  ;;  %s260_s9 = smov [#allocation2]   ;;  %s261_s11 = smov [#allocation5]  }
   0x3   :  { %s16_s10 = sshll.u32 %s260_s9, 4  ;;  %s26_s12 = sshll.u32 %s261_s11, 4  ;;  %s17_s10 = int_to_ptr.vmem [resolvable:$true] %s16_s10  ;;  %s27_s12 = int_to_ptr.vmem [resolvable:$true] %s26_s12 }
   0x4   :  { %s188_s15 = scalar_lea.hbm %s341_s0, 16 }
   0x5   :  { %p189_p0 = scmp.ne.s32.totalorder %s341_s0, %s188_s15  ;;  %p192_p1 = scmp.lt.u32.totalorder %s188_s15, %s341_s0 }
   0x7   :  { %p194_p2 = pnand %p192_p1, %p189_p0 }
   0x9   :  { %197 = shalt.err (!%p194_p2)
}
   0xa   :  { %s198_s20 = scalar_lea.vmem %s17_s10, 16  ;;  %s202_s21 = scalar_lea.vmem %s17_s10, 32 }
   0xb   :  { %p199_p3 = scmp.ne.s32.totalorder %s17_s10, %s198_s20  ;;  %p203_p4 = scmp.lt.s32.totalorder %s17_s10, %s17_s10 }
   0xc   :  { %p204_p5 = scmp.lt.s32.totalorder %s202_s21, %s198_s20 }
   0xe   :  { %p205_p6 = por %p204_p5, %p203_p4 }
  0x10   :  { %p206_p7 = pnand %p205_p6, %p199_p3 }
  0x12   :  { %209 = shalt.err (!%p206_p7)
}
  0x13   :  { %19 = dma.hbm_to_vmem [thread:$0]  %s341_s0, 16, %s17_s10, [#allocation3]  }
  0x14   :  { %s210_s26 = scalar_lea.hbm %s342_s1, 64 }
  0x15   :  { %p211_p8 = scmp.ne.s32.totalorder %s342_s1, %s210_s26  ;;  %p214_p9 = scmp.lt.u32.totalorder %s210_s26, %s342_s1 }
  0x17   :  { %p216_p10 = pnand %p214_p9, %p211_p8 }
  0x19   :  { %219 = shalt.err (!%p216_p10)
}
  0x1a   :  { %s220_s3 = scalar_lea.vmem %s27_s12, 64  ;;  %p225_p12 = scmp.lt.s32.totalorder %s27_s12, %s27_s12 }
  0x1b   :  { %p221_p11 = scmp.ne.s32.totalorder %s27_s12, %s220_s3  ;;  %p226_p13 = scmp.lt.s32.totalorder %s220_s3, %s220_s3 }
  0x1d   :  { %p227_p0 = por %p226_p13, %p225_p12 }
  0x1f   :  { %p228_p1 = pnand %p227_p0, %p221_p11 }
  0x21   :  { %231 = shalt.err (!%p228_p1)
}
  0x22   :  { %29 = dma.hbm_to_vmem [thread:$0]  %s342_s1, 64, %s27_s12, [#allocation6]  }
  0x23   :  { %254 = dma.done.wait [#allocation3], 16  }
  0x24   :  { %255 = vsyncadd [#allocation3], 4294967280 }
  0x25   :  { %256 = dma.done.wait [#allocation6], 64  }
  0x26   :  { %257 = vsyncadd [#allocation6], 4294967232  ;;  %v166_v0 = vld [vmem:[#allocation2] ss:$0 sm:$0xff]  ;;  %v37_v1 = vld [vmem:[#allocation5] sm:$0xf] }
  0x27   :  { %v308_v2 = vmul.f32 %v166_v0, %v37_v1  ;;  %v262_v14 = vmov 683565275   ;;  %v263_v16 = vmov 2475754826   ;;  %v264_v18 = vmov 2131351028  }
  0x28   :  { %v265_v20 = vmov 2102212464   ;;  %v266_v22 = vmov 920167782   ;;  %v267_v29 = vmov 1326507024  }
  0x29   :  { %v48_v3 = vand.u32 2139095040, %v308_v2  ;;  %v45_v5 = vand.u32 2147483647, %v308_v2  ;;  %vm47_vm7 = vcmp.lt.s32.totalorder %v308_v2, 0  ;;  %s268_s1 = smov [#allocation7]   ;;  %vm137_vm12 = vweird.f32 %v308_v2 }
  0x2a   :  { %s156_s5 = sshll.u32 %s268_s1, 4  ;;  %s157_s5 = int_to_ptr.vmem [resolvable:$true] %s156_s5 }
  0x2b   :  { %v49_v4 = vshrl.u32 %v48_v3, 23  ;;  %v52_v8 = vand.u32 8388607, %v45_v5  ;;  %vm46_vm8 = vcmp.le.f32.partialorder %v45_v5, 0.7853982  ;;  %s232_s6 = scalar_lea.vmem %s157_s5, 64  ;;  %p237_p3 = scmp.lt.s32.totalorder %s157_s5, %s157_s5 }
  0x2c   :  { %p233_p2 = scmp.ne.s32.totalorder %s157_s5, %s232_s6  ;;  %p238_p4 = scmp.lt.s32.totalorder %s232_s6, %s232_s6 }
  0x2d   :  { %v167_v6 = vadd.s32 4294967169, %v49_v4  ;;  %v53_v11 = vor.u32 8388608, %v52_v8 }
  0x2e   :  { %p239_p5 = por %p238_p4, %p237_p3 }
  0x2f   :  { %v55_v7 = vadd.s32 1, %v167_v6  ;;  %v93_v31 = vshll.u32 %v53_v11, 8 }
  0x30   :  { %p240_p6 = pnand %p239_p5, %p233_p2 }
  0x31   :  { %vm56_vm0 = vcmp.gt.s32.totalorder %v55_v7, 0 }
  0x32   :  { %v57_v9 = vsel %vm56_vm0, %v55_v7, 0 }
  0x33   :  { %v59_v10 = vand.u32 31, %v57_v9  ;;  %v58_v12 = vshrl.u32 %v57_v9, 5 }
  0x35   :  { %v60_v13 = vsub.s32 32, %v59_v10  ;;  %v62_v15 = vshll.u32 %v262_v14, %v59_v10  ;;  %v65_v17 = vshll.u32 %v263_v16, %v59_v10  ;;  %v68_v19 = vshll.u32 %v264_v18, %v59_v10 }
  0x36   :  { %v71_v21 = vshll.u32 %v265_v20, %v59_v10  ;;  %v74_v23 = vshll.u32 %v266_v22, %v59_v10  ;;  %vm77_vm1 = vcmp.lt.s32.totalorder %v58_v12, 1  ;;  %vm80_vm2 = vcmp.lt.s32.totalorder %v58_v12, 4 }
  0x37   :  { %v61_v24 = vshrl.u32 %v262_v14, %v60_v13  ;;  %v63_v25 = vshrl.u32 %v263_v16, %v60_v13  ;;  %v66_v26 = vshrl.u32 %v264_v18, %v60_v13  ;;  %v69_v27 = vshrl.u32 %v265_v20, %v60_v13 }
  0x38   :  { %v72_v28 = vshrl.u32 %v266_v22, %v60_v13  ;;  %v75_v30 = vshrl.u32 %v267_v29, %v60_v13  ;;  %vm78_vm3 = vcmp.lt.s32.totalorder %v58_v12, 2  ;;  %vm79_vm4 = vcmp.lt.s32.totalorder %v58_v12, 3 }
  0x39   :  { %v64_v32 = vor.u32 %v63_v25, %v62_v15  ;;  %v67_v33 = vor.u32 %v66_v26, %v65_v17  ;;  %v70_v34 = vor.u32 %v69_v27, %v68_v19 }
  0x3a   :  { %v73_v35 = vor.u32 %v72_v28, %v71_v21  ;;  %v76_v36 = vor.u32 %v75_v30, %v74_v23 }
  0x3b   :  { %v81_v37 = vsel %vm77_vm1, %v61_v24, %v64_v32  ;;  %v82_v38 = vsel %vm80_vm2, %v70_v34, 2102212464  ;;  %v85_v39 = vsel %vm77_vm1, %v64_v32, %v67_v33  ;;  %v89_v40 = vsel %vm77_vm1, %v67_v33, %v70_v34 }
  0x3c   :  { %v83_v41 = vsel %vm79_vm4, %v67_v33, %v82_v38  ;;  %v86_v42 = vsel %vm80_vm2, %v73_v35, 920167782  ;;  %v90_v43 = vsel %vm80_vm2, %v76_v36, 1326507024 }
  0x3d   :  { %v87_v44 = vsel %vm79_vm4, %v70_v34, %v86_v42  ;;  %v91_v45 = vsel %vm79_vm4, %v73_v35, %v90_v43  ;;  %v84_v46 = vsel %vm78_vm3, %v81_v37, %v83_v41 }
  0x3e   :  { %v88_v47 = vsel %vm78_vm3, %v85_v39, %v87_v44  ;;  %v92_v48 = vsel %vm78_vm3, %v89_v40, %v91_v45  ;;  %v100_v53 = vmul.u32 %v93_v31, %v84_v46 }
  0x3f   :  { %v314_v49 = vmul.u32.u64.low %v93_v31, %v92_v48  ;;  %v315_v50 = vmul.u32.u64.high %v93_v31, %v92_v48, %v314_v49  ;;  %v317_v51 = vmul.u32.u64.low %v93_v31, %v88_v47  ;;  %v318_v52 = vmul.u32.u64.high %v93_v31, %v88_v47, %v317_v51 }
  0x41   :  { %vm102_vm5 = vc.u32 %v315_v50, %v317_v51  ;;  %v103_v54 = vadd.s32 1, %v318_v52  ;;  %v101_v1 = vadd.s32 %v317_v51, %v315_v50 }
  0x43   :  { %v104_v55 = vsel %vm102_vm5, %v103_v54, %v318_v52 }
  0x44   :  { %v105_v56 = vadd.s32 %v104_v55, %v100_v53 }
  0x46   :  { %v106_v57 = vadd.s32 536870912, %v105_v56 }
  0x48   :  { %v107_v58 = vshrl.u32 %v106_v57, 30 }
  0x4a   :  { %v108_v59 = vshll.u32 %v107_v58, 30  ;;  %v131_v15 = vsub.s32 4, %v107_v58 }
  0x4c   :  { %v109_v60 = vsub.s32 %v105_v56, %v108_v59  ;;  %v132_v18 = vsel %vm47_vm7, %v131_v15, %v107_v58 }
  0x4d   :  { %v134_v21 = vsel %vm46_vm8, 0, %v132_v18 }
  0x4e   :  { %v111_v61 = vsub.s32 0, %v109_v60  ;;  %v138_v22 = vadd.s32 3, %v134_v21 }
  0x50   :  { %v168_v62 = vmin.u32 %v111_v61, %v109_v60  ;;  %v139_v23 = vand.u32 3, %v138_v22 }
  0x52   :  { %v113_v63 = vclz %v168_v62  ;;  %vm144_vm9 = vcmp.eq.s32.totalorder %v139_v23, 2  ;;  %vm141_vm10 = vcmp.eq.s32.totalorder %v139_v23, 0  ;;  %vm140_vm11 = vcmp.lt.s32.totalorder %v139_v23, 2 }
  0x54   :  { %v169_v0 = vadd.s32 4294967294, %v113_v63 }
  0x56   :  { %vm170_vm6 = vcmp.lt.s32.totalorder %v169_v0, 0 }
  0x57   :  { %v116_v3 = vsel %vm170_vm6, 0, %v169_v0 }
  0x58   :  { %v117_v4 = vsub.s32 32, %v116_v3  ;;  %v118_v6 = vshll.u32 %v109_v60, %v116_v3  ;;  %v121_v7 = vsub.s32 4294967266, %v116_v3 }
  0x5a   :  { %v119_v8 = vshrl.u32 %v101_v1, %v117_v4  ;;  %v122_v9 = vadd.s32 127, %v121_v7 }
  0x5c   :  { %v120_v10 = vor.u32 %v119_v8, %v118_v6  ;;  %v123_v11 = vshll.u32 %v122_v9, 23 }
  0x5e   :  { %v124_v12 = vor.u32 4788187, %v123_v11  ;;  %v127_v13 = vcvt.s32.f32 %v120_v10 }
  0x60   :  { %v125_v14 = vand.u32 2147483647, %v124_v12 }
  0x62   :  { %v128_v16 = vmul.f32 %v127_v13, %v125_v14 }
  0x64   :  { %v129_v17 = vxor.u32 2147483648, %v128_v16 }
  0x66   :  { %v130_v19 = vsel %vm47_vm7, %v129_v17, %v128_v16 }
  0x67   :  { %v133_v20 = vsel %vm46_vm8, %v308_v2, %v130_v19 }
  0x68   :  { %184 = vcosq.f32 %v133_v20 }
  0x69   :  { %186 = vsinq.f32 %v133_v20 }
  0x72   :  { %v185_v24 = vpop.eup %184 }
  0x73   :  { %v187_v25 = vpop.eup %186  ;;  %v145_v26 = vxor.u32 2147483648, %v185_v24 }
  0x74   :  { %v142_v27 = vxor.u32 2147483648, %v187_v25 }
  0x75   :  { %v146_v5 = vsel %vm144_vm9, %v145_v26, %v187_v25 }
  0x76   :  { %v143_v28 = vsel %vm141_vm10, %v185_v24, %v142_v27 }
  0x77   :  { %v147_v29 = vsel %vm140_vm11, %v143_v28, %v146_v5 }
  0x78   :  { %v148_v30 = vsel %vm137_vm12, nan, %v147_v29 }
  0x79   :  { %149 = vst [vmem:[#allocation7] sm:$0xf] %v148_v30 }
  0x7a   :  { %243 = shalt.err (!%p240_p6)
}
  0x7b   :  { %s244_s9 = scalar_lea.hbm %s343_s2, 64 }
  0x7c   :  { %p245_p7 = scmp.ne.s32.totalorder %s343_s2, %s244_s9  ;;  %p248_p8 = scmp.lt.u32.totalorder %s244_s9, %s343_s2 }
  0x7e   :  { %p250_p9 = pnand %p248_p8, %p245_p7 }
  0x80   :  { %253 = shalt.err (!%p250_p9)
}
  0x81   :  { %159 = dma.vmem_to_hbm [thread:$0]  %s157_s5, 64, %s343_s2, [#allocation4]  }
  0x82   :  { %258 = dma.done.wait [#allocation4], 64  }
  0x83   :  { %259 = vsyncadd [#allocation4], 4294967232 }
  0x84   :  { %163 = vsyncpa [#allocation3], 1 }
  0x85   :  { %164 = vsyncpa [#allocation6], 1 }
  0x86   :  { %165 = vsyncpa [#allocation4], 1 }

</bundles_post_ra>
